<compile_context>
chip_gen: v7x
topology: tpu7x:2x2x1
jax: 0.10.0
libtpu: 0.0.40
codegen_flags: <defaults>
</compile_context>

<pallas_src>
import jax
import jax.numpy as jnp
from jax.experimental import pallas as pl
from jax.experimental.pallas import tpu as pltpu


def _sem_decoder_kernel(adj_ref, rs_ref, z_ref, wa_ref, mat_z_ref, out_ref):
    # adj_ref:   (D, D)   inv(I - A^T)          (VMEM-resident, shared)
    # rs_ref:    (D, 1)   row-sums of adj       (shared, rank-1 bias factor)
    # z_ref:     (D, TN)  lane-dense column tile of flattened input_z
    # wa_ref:    (1, TN)  Wa tiled along the flattened (B*Z) axis
    # mat_z_ref: (D, TN)
    # out_ref:   (D, TN)
    adj = adj_ref[...]
    z = z_ref[...]
    wa = wa_ref[...]
    acc = jnp.dot(adj, z, preferred_element_type=jnp.float32)   # MXU, f32 acc
    mat_z = acc + rs_ref[...] * wa      # == adj @ (broadcast Wa), hoisted bias
    mat_z_ref[...] = mat_z.astype(mat_z_ref.dtype)
    out_ref[...] = (mat_z - wa).astype(out_ref.dtype)


def _round_up(x, m):
    return (x + m - 1) // m * m


def _choose_tile_n(n):
    # Lane-dense tiles: 128 minimum (vreg lane width / v5e MXU),
    # 256 preferred (v6e/v7x MXU width), 512 for large problems.
    if n <= 128:
        return 128
    if n <= 2048:
        return 256
    return 512


def _sem_decoder_pallas(adj_new1_f32, input_z, Wa):
    """Pallas path: adj (D,D) applied to flattened (D, B*Z) activations."""
    B, D, Z = input_z.shape
    dtype = input_z.dtype
    N = B * Z
    TN = _choose_tile_n(N)
    N_pad = _round_up(N, TN)
    grid_n = N_pad // TN

    # Flatten the batch into the matmul N dimension: (B, D, Z) -> (D, B*Z).
    z_flat = jnp.transpose(input_z, (1, 0, 2)).reshape(D, N)
    if N_pad != N:
        z_flat = jnp.pad(z_flat, ((0, 0), (0, N_pad - N)))

    wa_flat = jnp.tile(Wa.astype(dtype), B)          # column b*Z+z -> Wa[z]
    if N_pad != N:
        wa_flat = jnp.pad(wa_flat, (0, N_pad - N))
    wa_flat = wa_flat.reshape(1, N_pad)

    adj_c = adj_new1_f32.astype(dtype)
    rowsum = jnp.sum(adj_new1_f32, axis=1, keepdims=True).astype(dtype)  # (D,1)

    # VMEM budget: resident adj + double-buffered input/output tiles + slack.
    # Stays well below v7x's 64 MiB physical VMEM.
    # TODO(synk): if D grows so large that adj (D*D*4 bytes) no longer fits
    # comfortably in VMEM, add a K grid axis ("arbitrary") with a pl.when-
    # initialized f32 accumulator instead of keeping adj fully resident.
    elt = max(jnp.dtype(dtype).itemsize, 4)
    work_bytes = (D * D + D + 2 * (D * TN + TN) + 4 * D * TN) * elt
    vmem_limit = int(min(max(4 * work_bytes, 4 * 1024 * 1024),
                         32 * 1024 * 1024))

    mat_z_flat, out_flat = pl.pallas_call(
        _sem_decoder_kernel,
        out_shape=(
            jax.ShapeDtypeStruct((D, N_pad), dtype),
            jax.ShapeDtypeStruct((D, N_pad), dtype),
        ),
        grid_spec=pltpu.PrefetchScalarGridSpec(
            num_scalar_prefetch=0,
            grid=(grid_n,),
            in_specs=[
                pl.BlockSpec((D, D), lambda n: (0, 0)),    # adj (shared)
                pl.BlockSpec((D, 1), lambda n: (0, 0)),    # rowsum (shared)
                pl.BlockSpec((D, TN), lambda n: (0, n)),   # z column tile
                pl.BlockSpec((1, TN), lambda n: (0, n)),   # Wa tile
            ],
            out_specs=[
                pl.BlockSpec((D, TN), lambda n: (0, n)),
                pl.BlockSpec((D, TN), lambda n: (0, n)),
            ],
        ),
        compiler_params=pltpu.CompilerParams(
            dimension_semantics=("parallel",),
            vmem_limit_bytes=vmem_limit,
        ),
    )(adj_c, rowsum, z_flat, wa_flat)

    mat_z = jnp.transpose(mat_z_flat[:, :N].reshape(D, B, Z), (1, 0, 2))
    out = jnp.transpose(out_flat[:, :N].reshape(D, B, Z), (1, 0, 2))
    return mat_z, out


def sem_decoder_forward(inputs, input_z, n_in_node, rel_rec, rel_send,
                        origin_A, adj_A_tilt, Wa, *, force_pallas=None):
    """SEMDecoder.forward.

    input_z : [B, D, Z]
    origin_A: [D, D]
    Wa      : [Z]
    Returns (mat_z, mat_z - Wa, adj_A_tilt), matching the PyTorch module.
    """
    B, D, Z = input_z.shape
    dtype = input_z.dtype

    # preprocess_adj_new1: inv(I - A^T), always in fp32 for stable numerics.
    # TODO(synk): dense matrix inverse has no clean Pallas equivalent; it is a
    # small (D,D) parameter-preprocessing step, so it is done in plain JAX.
    adj_new1 = jnp.linalg.inv(
        jnp.eye(D, dtype=jnp.float32) - origin_A.astype(jnp.float32).T)

    use_pallas = force_pallas
    if use_pallas is None:
        # Tiny problems: a fused XLA einsum beats pallas_call fixed overhead.
        use_pallas = (B * Z) >= 256

    if not use_pallas:
        adj_c = adj_new1.astype(dtype)
        wa_c = Wa.astype(dtype)
        mat_z = jnp.einsum("ij,bjz->biz", adj_c, input_z + wa_c)
        return mat_z, mat_z - wa_c, adj_A_tilt

    mat_z, out = _sem_decoder_pallas(adj_new1, input_z, Wa)
    return mat_z, out, adj_A_tilt


def _reference(input_z, origin_A, Wa):
    D = origin_A.shape[0]
    adj_new1 = jnp.linalg.inv(
        jnp.eye(D, dtype=jnp.float32) - origin_A.astype(jnp.float32).T)
    mat_z = jnp.einsum("ij,bjz->biz", adj_new1, input_z + Wa)
    return mat_z, mat_z - Wa


def _run_case(key, B, D, Z, force_pallas):
    k1, k2, k3, k4 = jax.random.split(key, 4)
    input_z = jax.random.normal(k1, (B, D, Z), dtype=jnp.float32)
    # small-magnitude adjacency so (I - A^T) is well conditioned
    origin_A = 0.1 * jax.random.normal(k2, (D, D), dtype=jnp.float32)
    adj_A_tilt = jax.random.normal(k3, (D, D), dtype=jnp.float32)
    Wa = jax.random.normal(k4, (Z,), dtype=jnp.float32)

    # unused-by-forward arguments (kept for signature fidelity)
    inputs = jnp.zeros((B, D, 1), dtype=jnp.float32)
    rel_rec = jnp.zeros((D * (D - 1), D), dtype=jnp.float32)
    rel_send = jnp.zeros((D * (D - 1), D), dtype=jnp.float32)

    mat_z, out, tilt = sem_decoder_forward(
        inputs, input_z, 1, rel_rec, rel_send, origin_A, adj_A_tilt, Wa,
        force_pallas=force_pallas)
    jax.block_until_ready((mat_z, out, tilt))

    ref_mat_z, ref_out = _reference(input_z, origin_A, Wa)
    assert jnp.allclose(mat_z, ref_mat_z, atol=1e-4, rtol=1e-4)
    assert jnp.allclose(out, ref_out, atol=1e-4, rtol=1e-4)
    assert jnp.array_equal(tilt, adj_A_tilt)


if __name__ == "__main__":
    key = jax.random.PRNGKey(0)
    k_small, k_big = jax.random.split(key)

    # Case 1: tiny shipped shape (B=2, D=16, Z=8) — forced onto the Pallas
    # path to exercise the kernel + N-padding (16 -> 128 lanes).
    _run_case(k_small, B=2, D=16, Z=8, force_pallas=True)

    # Case 2: modest shape where the size-based dispatcher picks Pallas on its
    # own (B*Z = 256 -> one 256-wide lane-dense tile).
    _run_case(k_big, B=4, D=16, Z=64, force_pallas=None)

    print("KERNEL_OK")
</pallas_src>

<mosaic_0001>
module attributes {stable_mosaic.version = 11 : i64} {
  func.func @_sem_decoder_kernel(%arg0: i32, %arg1: memref<16x16xf32, #tpu.memory_space<vmem>>, %arg2: memref<16x1xf32, #tpu.memory_space<vmem>>, %arg3: memref<16x128xf32, #tpu.memory_space<vmem>>, %arg4: memref<1x128xf32, #tpu.memory_space<vmem>>, %arg5: memref<16x128xf32, #tpu.memory_space<vmem>>, %arg6: memref<16x128xf32, #tpu.memory_space<vmem>>) attributes {dimension_semantics = [#tpu.dimension_semantics<parallel>], iteration_bounds = array<i64: 1>, scalar_prefetch = 0 : i64, scratch_operands = 0 : i64, tpu.core_type = #tpu.core_type<tc>, window_params = [{pipeline_mode = #tpu.pipeline_mode<synchronous>, transform_indices = @transform_0, window_bounds = array<i64: 16, 16>}, {pipeline_mode = #tpu.pipeline_mode<synchronous>, transform_indices = @transform_1, window_bounds = array<i64: 16, 1>}, {transform_indices = @transform_2, window_bounds = array<i64: 16, 128>}, {transform_indices = @transform_3, window_bounds = array<i64: 1, 128>}, {transform_indices = @transform_4, window_bounds = array<i64: 16, 128>}, {transform_indices = @transform_5, window_bounds = array<i64: 16, 128>}]} {
    %c0 = arith.constant 0 : index
    %c0_0 = arith.constant 0 : index
    %0 = vector.load %arg1[%c0, %c0_0] : memref<16x16xf32, #tpu.memory_space<vmem>>, vector<16x16xf32>
    %c0_1 = arith.constant 0 : index
    %c0_2 = arith.constant 0 : index
    %1 = vector.load %arg3[%c0_1, %c0_2] : memref<16x128xf32, #tpu.memory_space<vmem>>, vector<16x128xf32>
    %c0_3 = arith.constant 0 : index
    %c0_4 = arith.constant 0 : index
    %2 = vector.load %arg4[%c0_3, %c0_4] : memref<1x128xf32, #tpu.memory_space<vmem>>, vector<1x128xf32>
    %cst = arith.constant dense<0.000000e+00> : vector<16x128xf32>
    %3 = tpu.matmul %0, %1, %cst {dimension_numbers = #tpu.dot_dimension_numbers<[1], [0], [0], [1], [0, 0, 1, 1], [], []>} : vector<16x16xf32>, vector<16x128xf32>, vector<16x128xf32> -> vector<16x128xf32>
    %c0_5 = arith.constant 0 : index
    %c0_6 = arith.constant 0 : index
    %4 = vector.load %arg2[%c0_5, %c0_6] : memref<16x1xf32, #tpu.memory_space<vmem>>, vector<16x1xf32>
    %5 = vector.broadcast %4 : vector<16x1xf32> to vector<16x128xf32>
    %6 = vector.broadcast %2 : vector<1x128xf32> to vector<16x128xf32>
    %7 = arith.mulf %5, %6 : vector<16x128xf32>
    %8 = arith.addf %3, %7 : vector<16x128xf32>
    %c0_7 = arith.constant 0 : index
    %c0_8 = arith.constant 0 : index
    %9 = vector.load %arg5[%c0_7, %c0_8] : memref<16x128xf32, #tpu.memory_space<vmem>>, vector<16x128xf32>
    tpu.vector_store %arg5[%c0_7, %c0_8], %8 {strides = array<i32>} : memref<16x128xf32, #tpu.memory_space<vmem>>, vector<16x128xf32>,
    %10 = vector.broadcast %2 : vector<1x128xf32> to vector<16x128xf32>
    %11 = arith.subf %8, %10 : vector<16x128xf32>
    %c0_9 = arith.constant 0 : index
    %c0_10 = arith.constant 0 : index
    %12 = vector.load %arg6[%c0_9, %c0_10] : memref<16x128xf32, #tpu.memory_space<vmem>>, vector<16x128xf32>
    tpu.vector_store %arg6[%c0_9, %c0_10], %11 {strides = array<i32>} : memref<16x128xf32, #tpu.memory_space<vmem>>, vector<16x128xf32>,
    return
  }
  func.func @transform_0(%arg0: i32) -> (i32, i32) {
    %c0_i32 = arith.constant 0 : i32
    %c0_i32_0 = arith.constant 0 : i32
    %c0_i32_1 = arith.constant 0 : i32
    return %c0_i32, %c0_i32_0 : i32, i32
  }
  func.func @transform_1(%arg0: i32) -> (i32, i32) {
    %c0_i32 = arith.constant 0 : i32
    %c0_i32_0 = arith.constant 0 : i32
    %c0_i32_1 = arith.constant 0 : i32
    return %c0_i32, %c0_i32_0 : i32, i32
  }
  func.func @transform_2(%arg0: i32) -> (i32, i32) {
    %c0_i32 = arith.constant 0 : i32
    %c0_i32_0 = arith.constant 0 : i32
    return %c0_i32, %arg0 : i32, i32
  }
  func.func @transform_3(%arg0: i32) -> (i32, i32) {
    %c0_i32 = arith.constant 0 : i32
    %c0_i32_0 = arith.constant 0 : i32
    return %c0_i32, %arg0 : i32, i32
  }
  func.func @transform_4(%arg0: i32) -> (i32, i32) {
    %c0_i32 = arith.constant 0 : i32
    %c0_i32_0 = arith.constant 0 : i32
    return %c0_i32, %arg0 : i32, i32
  }
  func.func @transform_5(%arg0: i32) -> (i32, i32) {
    %c0_i32 = arith.constant 0 : i32
    %c0_i32_0 = arith.constant 0 : i32
    return %c0_i32, %arg0 : i32, i32
  }
}

</mosaic_0001>

<bundles_post_ra>
// kernel: tpu_custom_call.1
= control target key start
LH: loop header
LB: loop body
LE: loop exit
PB: predicated region body
PF: predicated region fallthrough
CT: control target
= control target key end

     0   :  { %11 = vsyncpa [#allocation3], 0  ;;  %s381_s0 = inlined_call_operand.vmem [shape: f32[16,16], index: 0, kind: input, shape index: {}]   ;;  %s382_s1 = inlined_call_operand.vmem [shape: f32[16,1], index: 1, kind: input, shape index: {}]   ;;  %s383_s2 = inlined_call_operand.hbm [shape: f32[16,128], index: 2, kind: input, shape index: {}]   ;;  %s384_s3 = inlined_call_operand.vmem [shape: f32[1,128], index: 3, kind: input, shape index: {}]   ;;  %s385_s4 = inlined_call_operand.hbm [shape: f32[16,128], index: 4, kind: output, shape index: {0}]   ;;  %s386_s5 = inlined_call_operand.hbm [shape: f32[16,128], index: 5, kind: output, shape index: {1}]  }
   0x1   :  { %12 = vsyncpa [#allocation4], 0 }
   0x2   :  { %13 = vsyncpa [#allocation7], 0  ;;  %s278_s18 = smov [#allocation2]   ;;  %s206_s22 = scalar_lea.hbm %s383_s2, 256 }
   0x3   :  { %s23_s19 = sshll.u32 %s278_s18, 4  ;;  %p207_p0 = scmp.ne.s32.totalorder %s383_s2, %s206_s22  ;;  %s24_s19 = int_to_ptr.vmem [resolvable:$true] %s23_s19 }
   0x4   :  { %p210_p1 = scmp.lt.u32.totalorder %s206_s22, %s383_s2 }
   0x6   :  { %p212_p2 = pnand %p210_p1, %p207_p0 }
   0x8   :  { %215 = shalt.err (!%p212_p2)
}
   0x9   :  { %s216_s27 = scalar_lea.vmem %s24_s19, 256  ;;  %p221_p4 = scmp.lt.s32.totalorder %s24_s19, %s24_s19 }
   0xa   :  { %p217_p3 = scmp.ne.s32.totalorder %s24_s19, %s216_s27  ;;  %p222_p5 = scmp.lt.s32.totalorder %s216_s27, %s216_s27 }
   0xc   :  { %p223_p6 = por %p222_p5, %p221_p4 }
   0xe   :  { %p224_p7 = pnand %p223_p6, %p217_p3 }
  0x10   :  { %227 = shalt.err (!%p224_p7)
}
  0x11   :  { %s279_s28 = smov 128   ;;  %s280_s29 = smov 8  }
  0x12   :  { %29 = dma.hbm_to_vmem [thread:$0]  %s383_s2, 256, %s24_s19, [#allocation3], %s279_s28, %s279_s28, %s280_s29  }
  0x13   :  { %272 = dma.done.wait [#allocation3], 256  }
  0x14   :  { %273 = vsyncadd [#allocation3], 4294967040  ;;  %v281_v0 = vmov 0   ;;  %vm60_vm0 = vcmask 130048   ;;  %v37_v1 = vld [vmem:[#allocation2] sm:$0xff]  ;;  %v38_v2 = vld [vmem:[#allocation2 + $0x8] sm:$0xff] }
  0x15   :  { %205 = vset.pattern.permute.xlu0 %v281_v0  ;;  %v35_v3 = vld [vmem:[%s381_s0] sm:$0xff]  ;;  %v195_v4 = vpack.c.bf16 %v38_v2, %v37_v1  ;;  %v41_v6 = vld [vmem:[%s382_s1 + $0x8] sm:$0xff]  ;;  %s282_s16 = smov [#allocation5]  }
  0x16   :  { %192 = vmatprep.mubr.msk.f32.mxu0 %vm60_vm0, %v35_v3  ;;  %v40_v5 = vld [vmem:[%s382_s1] sm:$0xff]  ;;  %v36_v7 = vld [vmem:[%s381_s0 + $0x8] sm:$0xff]  ;;  %s153_s17 = sshll.u32 %s282_s16, 4  ;;  %s283_s1 = smov [#allocation6]   ;;  %s154_s17 = int_to_ptr.vmem [resolvable:$true] %s153_s17 }
  0x17   :  { %44 = vperm.xlu0 %205, %v40_v5   ;;  %196 = vmatprep.subr.bf16.mxu0 %v195_v4  ;;  %v181_v9 = vld [vmem:[%s384_s3] ss:$0 sm:$0xff]  ;;  %s165_s18 = sshll.u32 %s283_s1, 4  ;;  %s228_s0 = scalar_lea.vmem %s154_s17, 256  ;;  %s344_s18 = int_to_ptr.vmem [resolvable:$true] %s165_s18 }
  0x18   :  { %198 = vmatpush3.bf16.msra.mxu0 %v195_v4  ;;  %p229_p8 = scmp.ne.s32.totalorder %s154_s17, %s228_s0  ;;  %p233_p9 = scmp.lt.s32.totalorder %s154_s17, %s154_s17 }
  0x19   :  { %p234_p10 = scmp.lt.s32.totalorder %s228_s0, %s228_s0 }
  0x1b   :  { %49 = vperm.xlu0 %205, %v41_v6   ;;  %193 = vmatmul.mubr.msk.f32.vlgmr.msra.gmra.mrb[0].mxu0 %vm60_vm0, %v36_v7  ;;  %p235_p11 = por %p234_p10, %p233_p9 }
  0x1d   :  { %p236_p12 = pnand %p235_p11, %p229_p8 }
  0x96   :  { %v45_v8 = vpop.permute.xlu0 %44 }
  0x97   :  { %v58_v12 = vmul.f32 %v181_v9, %v45_v8 }
  0x9a   :  { %v50_v10 = vpop.permute.xlu0 %49 }
  0x9b   :  { %v59_v11 = vmul.f32 %v181_v9, %v50_v10 }
  0xee   :  { %v194_v13 = vpop.f32.mrb[0].mxu0 }
  0xef   :  { %v139_v14 = vadd.f32 %v194_v13, %v59_v11  ;;  %v133_v15 = vpop.f32.mrb[1].mxu0 }
  0xf0   :  { %v134_v16 = vadd.f32 %v133_v15, %v58_v12 }
  0xf1   :  { %143 = vst [vmem:[#allocation5 + $0x8] sm:$0xff] %v139_v14  ;;  %v145_v17 = vsub.f32 %v139_v14, %v181_v9 }
  0xf2   :  { %142 = vst [vmem:[#allocation5] sm:$0xff] %v134_v16  ;;  %v144_v18 = vsub.f32 %v134_v16, %v181_v9 }
  0xf3   :  { %147 = vst [vmem:[#allocation6 + $0x8] sm:$0xff] %v145_v17 }
  0xf4   :  { %239 = shalt.err (!%p236_p12)
}
  0xf5   :  { %s240_s20 = scalar_lea.hbm %s385_s4, 256 }
  0xf6   :  { %p241_p13 = scmp.ne.s32.totalorder %s385_s4, %s240_s20  ;;  %p244_p0 = scmp.lt.u32.totalorder %s240_s20, %s385_s4 }
  0xf8   :  { %p246_p1 = pnand %p244_p0, %p241_p13 }
  0xfa   :  { %249 = shalt.err (!%p246_p1)
}
  0xfb   :  { %159 = dma.vmem_to_hbm [thread:$0]  %s154_s17, 256, %s385_s4, [#allocation4], %s279_s28, %s279_s28, %s280_s29   ;;  %146 = vst [vmem:[#allocation6] sm:$0xff] %v144_v18 }
  0xfc   :  { %s250_s27 = scalar_lea.vmem %s344_s18, 256  ;;  %p255_p3 = scmp.lt.s32.totalorder %s344_s18, %s344_s18 }
  0xfd   :  { %p251_p2 = scmp.ne.s32.totalorder %s344_s18, %s250_s27  ;;  %p256_p4 = scmp.lt.s32.totalorder %s250_s27, %s250_s27 }
  0xff   :  { %p257_p5 = por %p256_p4, %p255_p3 }
 0x101   :  { %p258_p6 = pnand %p257_p5, %p251_p2 }
 0x103   :  { %261 = shalt.err (!%p258_p6)
}
 0x104   :  { %s262_s7 = scalar_lea.hbm %s386_s5, 256 }
 0x105   :  { %p263_p7 = scmp.ne.s32.totalorder %s386_s5, %s262_s7  ;;  %p266_p8 = scmp.lt.u32.totalorder %s262_s7, %s386_s5 }
 0x107   :  { %p268_p9 = pnand %p266_p8, %p263_p7 }
 0x109   :  { %271 = shalt.err (!%p268_p9)
}
 0x10a   :  { %171 = dma.vmem_to_hbm [thread:$0]  %s344_s18, 256, %s386_s5, [#allocation7], %s279_s28, %s279_s28, %s280_s29  }
 0x10b   :  { %274 = dma.done.wait [#allocation4], 256  }
 0x10c   :  { %275 = vsyncadd [#allocation4], 4294967040 }
 0x10d   :  { %276 = dma.done.wait [#allocation7], 256  }
 0x10e   :  { %277 = vsyncadd [#allocation7], 4294967040 }
 0x10f   :  { %178 = vsyncpa [#allocation3], 1 }
 0x110   :  { %179 = vsyncpa [#allocation4], 1 }
 0x111   :  { %180 = vsyncpa [#allocation7], 1 }

</bundles_post_ra>
